<compile_context>
chip_gen: v5e
topology: v5e:2x2
jax: 0.10.0
libtpu: 0.0.40
codegen_flags: <defaults>
</compile_context>

<pallas_src>
import math
import functools

import jax
import jax.numpy as jnp
import numpy as np
from jax import lax
from jax.experimental import pallas as pl
from jax.experimental.pallas import tpu as pltpu


def _rel_mha_kernel(
    lens_ref,                      # SMEM (B,) int32: valid key length per batch
    q_ref, k_ref, v_ref,           # (1,TQ,D) / (1,T2,D) / (1,T2,D) bf16
    ph_ref,                        # (H, dk, Lpad) bf16: projected pos. window
    wq_ref, wk_ref, wv_ref,        # (D, D) bf16 (W_q pre-scaled by 1/sqrt(dk))
    wo_ref,                        # (H, dk, D) bf16: W_o^T split per head
    bias_ref,                      # (8, D) f32: [bu_eff, bv_eff, b_k, b_v, b_o, 0, 0, 0]
    out_ref,                       # (1, TQ, D) f32
    q_u_s, q_v_s,                  # VMEM (H, TQ, dk) bf16 scratch
    khT_s,                         # VMEM (H, dk, T2) bf16 scratch (persists over q tiles)
    vh_s,                          # VMEM (H, T2, dk) bf16 scratch (persists over q tiles)
    acc_s,                         # VMEM (TQ, D) f32 scratch (output accumulator)
    *, t1, t2, tq, dk, n_heads, lpad, nq):
    f32, bf16 = jnp.float32, jnp.bfloat16
    b = pl.program_id(0)
    qi = pl.program_id(1)

    # ---- K/V projection + head-major re-layout: once per batch element ------
    @pl.when(qi == 0)
    def _():
        kh_f = jnp.dot(k_ref[0], wk_ref[...], preferred_element_type=f32) \
               + bias_ref[2:3, :]                       # (T2, D) f32
        vh = (jnp.dot(v_ref[0], wv_ref[...], preferred_element_type=f32)
              + bias_ref[3:4, :]).astype(bf16)          # (T2, D)
        khT = kh_f.T.astype(bf16)                       # (D, T2) one XLU transpose
        for h in range(n_heads):                        # static fill loop (small copies)
            khT_s[h] = khT[h * dk:(h + 1) * dk, :]      # (dk, T2) sublane slice
            vh_s[h] = vh[:, h * dk:(h + 1) * dk]        # (T2, dk)

    # ---- Q projection for this query tile ------------------------------------
    qh = jnp.dot(q_ref[0], wq_ref[...], preferred_element_type=f32)    # (TQ, D)
    q_u = (qh + bias_ref[0:1, :]).astype(bf16)   # content query (+ (b_q+b_u)/sqrt(dk))
    q_v = (qh + bias_ref[1:2, :]).astype(bf16)   # position query (+ (b_q+b_v)/sqrt(dk))
    for h in range(n_heads):
        q_u_s[h] = q_u[:, h * dk:(h + 1) * dk]
        q_v_s[h] = q_v[:, h * dk:(h + 1) * dk]

    # ---- masks (global row index) and relative-shift rotation amount --------
    row0 = qi * tq
    row = lax.broadcasted_iota(jnp.int32, (tq, t2), 0) + row0
    col = lax.broadcasted_iota(jnp.int32, (tq, t2), 1)
    key_valid = col < lens_ref[b]                # contiguous key-prefix mask
    tri = (col - row) <= (t2 - t1)               # tril(t2 - t1) of the rel shift

    # ph was windowed to rows [t2, 2*t2) in the wrapper, so the target read is
    # bd[r, j] = bd_full[r, t1 - 1 - r + j]  ->  per-row rotate by base + r.
    base = (lpad - ((t1 - 1) % lpad)) % lpad
    if nq == 1:
        shift0 = base                            # static shift (single-tile path)
    else:
        shift0 = lax.rem(base + row0, lpad)      # dynamic shift when query-tiled

    acc_s[...] = jnp.zeros_like(acc_s)

    # ---- per-head attention: fori_loop bounds live ranges to one head -------
    def head_body(h, carry):
        ac = jnp.dot(q_u_s[h], khT_s[h], preferred_element_type=f32)        # (TQ, T2)
        bd_full = jnp.dot(q_v_s[h], ph_ref[h], preferred_element_type=f32)  # (TQ, Lpad)
        rolled = pltpu.roll(bd_full, shift=shift0, axis=1, stride=1, stride_axis=0)
        bd = jnp.where(tri, rolled[:, :t2], 0.0)
        scores = jnp.where(key_valid, ac + bd, -1e30)    # finite -> no NaN rows
        m = jnp.max(scores, axis=-1, keepdims=True)
        e = jnp.exp(scores - m)
        attn = e * pl.reciprocal(jnp.sum(e, axis=-1, keepdims=True), approx=True)
        # TODO(synk): dropout on attn is stateful train-mode RNG; identity here (eval).
        pv = jnp.dot(attn.astype(bf16), vh_s[h], preferred_element_type=f32)  # (TQ, dk)
        acc_s[...] += jnp.dot(pv.astype(bf16), wo_ref[h],
                              preferred_element_type=f32)                     # (TQ, D)
        return carry

    lax.fori_loop(0, n_heads, head_body, 0)

    out_ref[0] = (acc_s[...] + bias_ref[4:5, :]).astype(out_ref.dtype)


def rel_pos_mha(q, k, v, mask, params, num_heads, *, q_tile=256):
    """Pallas forward of RelativePositionalMultiHeadAttention (eval mode).

    `mask` is a key-padding mask broadcastable to (B, 1, 1, T2) with a
    contiguous valid prefix per batch; it is converted to per-batch lengths.
    """
    B, T1, D = q.shape
    T2 = k.shape[1]
    H = num_heads
    dk = D // H
    assert D % H == 0

    # Query-tile size: full T1 when small, otherwise a divisor that is a
    # multiple of 8 (falls back to a single tile if none divides T1).
    if T1 <= q_tile:
        TQ = T1
    else:
        TQ = T1
        for cand in (q_tile, 128, 64, 32, 16, 8):
            if T1 % cand == 0:
                TQ = cand
                break
    NQ = T1 // TQ

    lpad = pl.cdiv(T1 + T2 - 1, 128) * 128       # lane-aligned positional window
    scale = 1.0 / math.sqrt(dk)

    # ---- plain-JAX glue ------------------------------------------------------
    # Sinusoidal positional encoding, flipped, projected ONCE by W_p (no bias),
    # windowed to the only rows read after the tril (rows [T2, 2*T2)), laid out
    # head-major and lane-dense as (H, dk, Lpad).
    pos = jnp.arange(2 * T2, dtype=jnp.float32)[:, None]
    theta = pos / (10000.0 ** (jnp.arange(0, D, 2, dtype=jnp.float32) / D))
    pe = jnp.stack([jnp.sin(theta), jnp.cos(theta)], axis=-1).reshape(2 * T2, D)
    pe = jnp.flip(pe, axis=0)
    ph = pe @ params['W_p'].T                               # (2*T2, D)
    ph = ph[T2:, :]                                         # (T2, D) window
    ph = ph.reshape(T2, H, dk).transpose(1, 2, 0)           # (H, dk, T2)
    ph = jnp.pad(ph, ((0, 0), (0, 0), (0, lpad - T2)))      # (H, dk, Lpad)

    # Fold the 1/sqrt(d_k) score scale into the query path; fold b_q into the
    # u/v positional biases; pack the remaining biases into one (8, D) operand.
    wq_t = (params['W_q'] * scale).T
    wk_t = params['W_k'].T
    wv_t = params['W_v'].T
    wo_h = params['W_o'].T.reshape(H, dk, D)                # W_o^T split per head
    bu_eff = (params['b_q'] + params['pos_bias_u'].reshape(-1)) * scale
    bv_eff = (params['b_q'] + params['pos_bias_v'].reshape(-1)) * scale
    bias_pack = jnp.zeros((8, D), jnp.float32)
    bias_pack = bias_pack.at[0].set(bu_eff).at[1].set(bv_eff)
    bias_pack = bias_pack.at[2].set(params['b_k']).at[3].set(params['b_v'])
    bias_pack = bias_pack.at[4].set(params['b_o'])

    # Key-padding mask -> per-batch valid key length (scalar prefetch / SMEM).
    # TODO(synk): a full (B, 1, T1, T2) per-query mask would need a dense path.
    km = jnp.reshape(mask, (B, -1, T2))[:, 0, :]
    lens = jnp.sum(km.astype(jnp.int32), axis=-1).astype(jnp.int32)

    bf16 = jnp.bfloat16
    operands = (lens,
                q.astype(bf16), k.astype(bf16), v.astype(bf16), ph.astype(bf16),
                wq_t.astype(bf16), wk_t.astype(bf16), wv_t.astype(bf16),
                wo_h.astype(bf16), bias_pack.astype(jnp.float32))

    kernel = functools.partial(_rel_mha_kernel, t1=T1, t2=T2, tq=TQ, dk=dk,
                               n_heads=H, lpad=lpad, nq=NQ)

    bq_map = lambda b, qi, lens_r: (b, qi, 0)
    bkv_map = lambda b, qi, lens_r: (b, 0, 0)
    fixed2 = lambda b, qi, lens_r: (0, 0)
    fixed3 = lambda b, qi, lens_r: (0, 0, 0)

    grid_spec = pltpu.PrefetchScalarGridSpec(
        num_scalar_prefetch=1,
        grid=(B, NQ),
        in_specs=[
            pl.BlockSpec((1, TQ, D), bq_map),      # q tile
            pl.BlockSpec((1, T2, D), bkv_map),     # k (same block across q tiles)
            pl.BlockSpec((1, T2, D), bkv_map),     # v
            pl.BlockSpec((H, dk, lpad), fixed3),   # positional projection window
            pl.BlockSpec((D, D), fixed2),          # W_q^T (pre-scaled)
            pl.BlockSpec((D, D), fixed2),          # W_k^T
            pl.BlockSpec((D, D), fixed2),          # W_v^T
            pl.BlockSpec((H, dk, D), fixed3),      # W_o^T per head
            pl.BlockSpec((8, D), fixed2),          # packed biases
        ],
        out_specs=pl.BlockSpec((1, TQ, D), bq_map),
        scratch_shapes=[
            pltpu.VMEM((H, TQ, dk), bf16),         # q_u (head-major)
            pltpu.VMEM((H, TQ, dk), bf16),         # q_v (head-major)
            pltpu.VMEM((H, dk, T2), bf16),         # k^T (head-major, persists)
            pltpu.VMEM((H, T2, dk), bf16),         # v   (head-major, persists)
            pltpu.VMEM((TQ, D), jnp.float32),      # output accumulator
        ],
    )

    # Advisory cost + a scoped-VMEM limit sized to the per-step footprint.
    flops = int(B * (2 * D * D * (T1 + 2 * T2)
                     + 2 * T1 * D * (2 * T2 + lpad + D)))
    cost = pl.CostEstimate(
        flops=flops,
        transcendentals=int(B * H * T1 * T2),
        bytes_accessed=int(2 * (B * (T1 + 2 * T2) * D + D * lpad + 4 * D * D)
                           + 4 * (8 * D + B * T1 * D + B)))

    blocks_b = 2 * 2 * (TQ * D + 2 * T2 * D + D * lpad + 4 * D * D) \
               + 2 * 4 * (8 * D + TQ * D)
    scratch_b = 2 * (2 * TQ * D + 2 * D * T2) + 4 * TQ * D
    working_b = 4 * (3 * TQ * (T2 + lpad) + 3 * TQ * D + 2 * T2 * D)
    vmem_limit = int(min(max(2 * (blocks_b + scratch_b + working_b),
                             32 * 1024 * 1024), 56 * 1024 * 1024))

    return pl.pallas_call(
        kernel,
        out_shape=jax.ShapeDtypeStruct((B, T1, D), jnp.float32),
        grid_spec=grid_spec,
        compiler_params=pltpu.CompilerParams(
            dimension_semantics=("parallel", "arbitrary"),
            vmem_limit_bytes=vmem_limit),
        cost_estimate=cost,
    )(*operands)


def reference_forward(q, k, v, mask, params, num_heads):
    """Literal JAX translation of the PyTorch forward (for verification)."""
    B, T1, D = q.shape
    T2 = k.shape[1]
    H = num_heads
    dk = D // H
    pos = jnp.arange(2 * T2, dtype=jnp.float32)[:, None]
    theta = pos / (10000.0 ** (jnp.arange(0, D, 2, dtype=jnp.float32) / D))
    pe = jnp.stack([jnp.sin(theta), jnp.cos(theta)], axis=-1).reshape(2 * T2, D)
    pe = jnp.flip(pe, axis=0)
    p = (pe @ params['W_p'].T).reshape(1, 2 * T2, H, dk).transpose(0, 2, 1, 3)
    qh = (q @ params['W_q'].T + params['b_q']).reshape(B, T1, H, dk).transpose(0, 2, 1, 3)
    kh = (k @ params['W_k'].T + params['b_k']).reshape(B, T2, H, dk).transpose(0, 2, 1, 3)
    vh = (v @ params['W_v'].T + params['b_v']).reshape(B, T2, H, dk).transpose(0, 2, 1, 3)
    ac = jnp.einsum('bhid,bhjd->bhij', qh + params['pos_bias_u'][None, :, None, :], kh)
    bd = jnp.einsum('bhid,bhjd->bhij', qh + params['pos_bias_v'][None, :, None, :], p)
    bd_flat = bd.reshape(B, H, T1 * 2 * T2)[..., T1 + T2 - 1:]
    idx = jnp.arange(T1)[:, None] * (2 * T2 - 1) + jnp.arange(T2)[None, :]
    bd_u = bd_flat[..., idx]                                   # unfold
    tri = (jnp.arange(T2)[None, :] - jnp.arange(T1)[:, None]) <= (T2 - T1)
    bd_u = jnp.where(tri, bd_u, 0.0)                           # tril(t2 - t1)
    x = (ac + bd_u) / math.sqrt(dk)
    x = jnp.where(mask, x, -jnp.inf)
    x = jax.nn.softmax(x, axis=-1)
    x = jnp.einsum('bhij,bhjd->bhid', x, vh)
    x = x.transpose(0, 2, 1, 3).reshape(B, T1, D)
    return x @ params['W_o'].T + params['b_o']


if __name__ == "__main__":
    B, T1, T2, D, H = 2, 8, 8, 32, 4
    dk = D // H

    key = jax.random.PRNGKey(0)
    ks = jax.random.split(key, 16)
    q = jax.random.normal(ks[0], (B, T1, D), jnp.float32)
    k = jax.random.normal(ks[1], (B, T2, D), jnp.float32)
    v = jax.random.normal(ks[2], (B, T2, D), jnp.float32)

    s = 1.0 / math.sqrt(D)
    params = {
        'W_q': jax.random.uniform(ks[3], (D, D), jnp.float32, -s, s),
        'b_q': jax.random.uniform(ks[4], (D,), jnp.float32, -s, s),
        'W_k': jax.random.uniform(ks[5], (D, D), jnp.float32, -s, s),
        'b_k': jax.random.uniform(ks[6], (D,), jnp.float32, -s, s),
        'W_v': jax.random.uniform(ks[7], (D, D), jnp.float32, -s, s),
        'b_v': jax.random.uniform(ks[8], (D,), jnp.float32, -s, s),
        'W_o': jax.random.uniform(ks[9], (D, D), jnp.float32, -s, s),
        'b_o': jax.random.uniform(ks[10], (D,), jnp.float32, -s, s),
        'W_p': jax.random.uniform(ks[11], (D, D), jnp.float32, -s, s),
        'pos_bias_u': jax.random.uniform(ks[12], (H, dk), jnp.float32, -s, s),
        'pos_bias_v': jax.random.uniform(ks[13], (H, dk), jnp.float32, -s, s),
    }

    # key-padding mask: (batch, 1, 1, time2) bool (batch 1 has 3 padded keys)
    lengths = jnp.array([T2, T2 - 3])
    mask = (jnp.arange(T2)[None, :] < lengths[:, None])[:, None, None, :]

    out = rel_pos_mha(q, k, v, mask, params, H)
    out = jax.block_until_ready(out)

    ref = reference_forward(q, k, v, mask, params, H)
    err = float(np.max(np.abs(np.asarray(out) - np.asarray(ref))))
    assert np.allclose(np.asarray(out), np.asarray(ref), atol=5e-2, rtol=5e-2), err

    print("KERNEL_OK")
</pallas_src>

<mosaic_0001>
module attributes {stable_mosaic.version = 11 : i64} {
  func.func @_rel_mha_kernel(%arg0: i32, %arg1: i32, %arg2: memref<2xi32, #tpu.memory_space<smem>>, %arg3: memref<1x8x32xbf16, #tpu.memory_space<vmem>>, %arg4: memref<1x8x32xbf16, #tpu.memory_space<vmem>>, %arg5: memref<1x8x32xbf16, #tpu.memory_space<vmem>>, %arg6: memref<4x8x128xbf16, #tpu.memory_space<vmem>>, %arg7: memref<32x32xbf16, #tpu.memory_space<vmem>>, %arg8: memref<32x32xbf16, #tpu.memory_space<vmem>>, %arg9: memref<32x32xbf16, #tpu.memory_space<vmem>>, %arg10: memref<4x8x32xbf16, #tpu.memory_space<vmem>>, %arg11: memref<8x32xf32, #tpu.memory_space<vmem>>, %arg12: memref<1x8x32xf32, #tpu.memory_space<vmem>>, %arg13: memref<4x8x8xbf16, #tpu.memory_space<vmem>>, %arg14: memref<4x8x8xbf16, #tpu.memory_space<vmem>>, %arg15: memref<4x8x8xbf16, #tpu.memory_space<vmem>>, %arg16: memref<4x8x8xbf16, #tpu.memory_space<vmem>>, %arg17: memref<8x32xf32, #tpu.memory_space<vmem>>) attributes {dimension_semantics = [#tpu.dimension_semantics<parallel>, #tpu.dimension_semantics<arbitrary>], iteration_bounds = array<i64: 2, 1>, scalar_prefetch = 1 : i64, scratch_operands = 5 : i64, tpu.core_type = #tpu.core_type<tc>, window_params = [{transform_indices = @transform_0, window_bounds = array<i64: 1, 8, 32>}, {transform_indices = @transform_1, window_bounds = array<i64: 1, 8, 32>}, {transform_indices = @transform_2, window_bounds = array<i64: 1, 8, 32>}, {pipeline_mode = #tpu.pipeline_mode<synchronous>, transform_indices = @transform_3, window_bounds = array<i64: 4, 8, 128>}, {pipeline_mode = #tpu.pipeline_mode<synchronous>, transform_indices = @transform_4, window_bounds = array<i64: 32, 32>}, {pipeline_mode = #tpu.pipeline_mode<synchronous>, transform_indices = @transform_5, window_bounds = array<i64: 32, 32>}, {pipeline_mode = #tpu.pipeline_mode<synchronous>, transform_indices = @transform_6, window_bounds = array<i64: 32, 32>}, {pipeline_mode = #tpu.pipeline_mode<synchronous>, transform_indices = @transform_7, window_bounds = array<i64: 4, 8, 32>}, {pipeline_mode = #tpu.pipeline_mode<synchronous>, transform_indices = @transform_8, window_bounds = array<i64: 8, 32>}, {transform_indices = @transform_9, window_bounds = array<i64: 1, 8, 32>}]} {
    %c0_i32 = arith.constant 0 : i32
    %0 = arith.cmpi eq, %arg1, %c0_i32 : i32
    %1 = arith.extui %0 : i1 to i32
    %c0_i32_0 = arith.constant 0 : i32
    %2 = arith.cmpi ne, %1, %c0_i32_0 : i32
    scf.if %2 {
      %c0_42 = arith.constant 0 : index
      %c0_43 = arith.constant 0 : index
      %c0_44 = arith.constant 0 : index
      %69 = vector.load %arg4[%c0_42, %c0_43, %c0_44] : memref<1x8x32xbf16, #tpu.memory_space<vmem>>, vector<1x8x32xbf16>
      %70 = vector.shape_cast %69 : vector<1x8x32xbf16> to vector<8x32xbf16>
      %c0_45 = arith.constant 0 : index
      %c0_46 = arith.constant 0 : index
      %71 = vector.load %arg8[%c0_45, %c0_46] : memref<32x32xbf16, #tpu.memory_space<vmem>>, vector<32x32xbf16>
      %cst_47 = arith.constant dense<0.000000e+00> : vector<8x32xf32>
      %72 = tpu.matmul %70, %71, %cst_47 {dimension_numbers = #tpu.dot_dimension_numbers<[1], [0], [0], [1], [0, 0, 1, 1], [], []>} : vector<8x32xbf16>, vector<32x32xbf16>, vector<8x32xf32> -> vector<8x32xf32>
      %c2_48 = arith.constant 2 : index
      %c0_49 = arith.constant 0 : index
      %73 = vector.load %arg11[%c2_48, %c0_49] : memref<8x32xf32, #tpu.memory_space<vmem>>, vector<1x32xf32>
      %74 = vector.broadcast %73 : vector<1x32xf32> to vector<8x32xf32>
      %75 = arith.addf %72, %74 : vector<8x32xf32>
      %c0_50 = arith.constant 0 : index
      %c0_51 = arith.constant 0 : index
      %c0_52 = arith.constant 0 : index
      %76 = vector.load %arg5[%c0_50, %c0_51, %c0_52] : memref<1x8x32xbf16, #tpu.memory_space<vmem>>, vector<1x8x32xbf16>
      %77 = vector.shape_cast %76 : vector<1x8x32xbf16> to vector<8x32xbf16>
      %c0_53 = arith.constant 0 : index
      %c0_54 = arith.constant 0 : index
      %78 = vector.load %arg9[%c0_53, %c0_54] : memref<32x32xbf16, #tpu.memory_space<vmem>>, vector<32x32xbf16>
      %cst_55 = arith.constant dense<0.000000e+00> : vector<8x32xf32>
      %79 = tpu.matmul %77, %78, %cst_55 {dimension_numbers = #tpu.dot_dimension_numbers<[1], [0], [0], [1], [0, 0, 1, 1], [], []>} : vector<8x32xbf16>, vector<32x32xbf16>, vector<8x32xf32> -> vector<8x32xf32>
      %c3_56 = arith.constant 3 : index
      %c0_57 = arith.constant 0 : index
      %80 = vector.load %arg11[%c3_56, %c0_57] : memref<8x32xf32, #tpu.memory_space<vmem>>, vector<1x32xf32>
      %81 = vector.broadcast %80 : vector<1x32xf32> to vector<8x32xf32>
      %82 = arith.addf %79, %81 : vector<8x32xf32>
      %83 = arith.truncf %82 : vector<8x32xf32> to vector<8x32xbf16>
      %84 = tpu.transpose %75, [1, 0] : vector<8x32xf32> -> vector<32x8xf32>
      %85 = arith.truncf %84 : vector<32x8xf32> to vector<32x8xbf16>
      %86 = vector.extract_strided_slice %85 {offsets = [0, 0], sizes = [8, 8], strides = [1, 1]} : vector<32x8xbf16> to vector<8x8xbf16>
      %c0_58 = arith.constant 0 : index
      %c0_59 = arith.constant 0 : index
      %c0_60 = arith.constant 0 : index
      %87 = vector.load %arg15[%c0_58, %c0_59, %c0_60] : memref<4x8x8xbf16, #tpu.memory_space<vmem>>, vector<1x8x8xbf16>
      %88 = vector.shape_cast %87 : vector<1x8x8xbf16> to vector<8x8xbf16>
      %89 = vector.shape_cast %86 : vector<8x8xbf16> to vector<1x8x8xbf16>
      tpu.vector_store %arg15[%c0_58, %c0_59, %c0_60], %89 {strides = array<i32>} : memref<4x8x8xbf16, #tpu.memory_space<vmem>>, vector<1x8x8xbf16>,
      %90 = vector.extract_strided_slice %83 {offsets = [0, 0], sizes = [8, 8], strides = [1, 1]} : vector<8x32xbf16> to vector<8x8xbf16>
      %c0_61 = arith.constant 0 : index
      %c0_62 = arith.constant 0 : index
      %c0_63 = arith.constant 0 : index
      %91 = vector.load %arg16[%c0_61, %c0_62, %c0_63] : memref<4x8x8xbf16, #tpu.memory_space<vmem>>, vector<1x8x8xbf16>
      %92 = vector.shape_cast %91 : vector<1x8x8xbf16> to vector<8x8xbf16>
      %93 = vector.shape_cast %90 : vector<8x8xbf16> to vector<1x8x8xbf16>
      tpu.vector_store %arg16[%c0_61, %c0_62, %c0_63], %93 {strides = array<i32>} : memref<4x8x8xbf16, #tpu.memory_space<vmem>>, vector<1x8x8xbf16>,
      %94 = vector.extract_strided_slice %85 {offsets = [8, 0], sizes = [8, 8], strides = [1, 1]} : vector<32x8xbf16> to vector<8x8xbf16>
      %c1_64 = arith.constant 1 : index
      %c0_65 = arith.constant 0 : index
      %c0_66 = arith.constant 0 : index
      %95 = vector.load %arg15[%c1_64, %c0_65, %c0_66] : memref<4x8x8xbf16, #tpu.memory_space<vmem>>, vector<1x8x8xbf16>
      %96 = vector.shape_cast %95 : vector<1x8x8xbf16> to vector<8x8xbf16>
      %97 = vector.shape_cast %94 : vector<8x8xbf16> to vector<1x8x8xbf16>
      tpu.vector_store %arg15[%c1_64, %c0_65, %c0_66], %97 {strides = array<i32>} : memref<4x8x8xbf16, #tpu.memory_space<vmem>>, vector<1x8x8xbf16>,
      %98 = vector.extract_strided_slice %83 {offsets = [0, 8], sizes = [8, 8], strides = [1, 1]} : vector<8x32xbf16> to vector<8x8xbf16>
      %c1_67 = arith.constant 1 : index
      %c0_68 = arith.constant 0 : index
      %c0_69 = arith.constant 0 : index
      %99 = vector.load %arg16[%c1_67, %c0_68, %c0_69] : memref<4x8x8xbf16, #tpu.memory_space<vmem>>, vector<1x8x8xbf16>
      %100 = vector.shape_cast %99 : vector<1x8x8xbf16> to vector<8x8xbf16>
      %101 = vector.shape_cast %98 : vector<8x8xbf16> to vector<1x8x8xbf16>
      tpu.vector_store %arg16[%c1_67, %c0_68, %c0_69], %101 {strides = array<i32>} : memref<4x8x8xbf16, #tpu.memory_space<vmem>>, vector<1x8x8xbf16>,
      %102 = vector.extract_strided_slice %85 {offsets = [16, 0], sizes = [8, 8], strides = [1, 1]} : vector<32x8xbf16> to vector<8x8xbf16>
      %c2_70 = arith.constant 2 : index
      %c0_71 = arith.constant 0 : index
      %c0_72 = arith.constant 0 : index
      %103 = vector.load %arg15[%c2_70, %c0_71, %c0_72] : memref<4x8x8xbf16, #tpu.memory_space<vmem>>, vector<1x8x8xbf16>
      %104 = vector.shape_cast %103 : vector<1x8x8xbf16> to vector<8x8xbf16>
      %105 = vector.shape_cast %102 : vector<8x8xbf16> to vector<1x8x8xbf16>
      tpu.vector_store %arg15[%c2_70, %c0_71, %c0_72], %105 {strides = array<i32>} : memref<4x8x8xbf16, #tpu.memory_space<vmem>>, vector<1x8x8xbf16>,
      %106 = vector.extract_strided_slice %83 {offsets = [0, 16], sizes = [8, 8], strides = [1, 1]} : vector<8x32xbf16> to vector<8x8xbf16>
      %c2_73 = arith.constant 2 : index
      %c0_74 = arith.constant 0 : index
      %c0_75 = arith.constant 0 : index
      %107 = vector.load %arg16[%c2_73, %c0_74, %c0_75] : memref<4x8x8xbf16, #tpu.memory_space<vmem>>, vector<1x8x8xbf16>
      %108 = vector.shape_cast %107 : vector<1x8x8xbf16> to vector<8x8xbf16>
      %109 = vector.shape_cast %106 : vector<8x8xbf16> to vector<1x8x8xbf16>
      tpu.vector_store %arg16[%c2_73, %c0_74, %c0_75], %109 {strides = array<i32>} : memref<4x8x8xbf16, #tpu.memory_space<vmem>>, vector<1x8x8xbf16>,
      %110 = vector.extract_strided_slice %85 {offsets = [24, 0], sizes = [8, 8], strides = [1, 1]} : vector<32x8xbf16> to vector<8x8xbf16>
      %c3_76 = arith.constant 3 : index
      %c0_77 = arith.constant 0 : index
      %c0_78 = arith.constant 0 : index
      %111 = vector.load %arg15[%c3_76, %c0_77, %c0_78] : memref<4x8x8xbf16, #tpu.memory_space<vmem>>, vector<1x8x8xbf16>
      %112 = vector.shape_cast %111 : vector<1x8x8xbf16> to vector<8x8xbf16>
      %113 = vector.shape_cast %110 : vector<8x8xbf16> to vector<1x8x8xbf16>
      tpu.vector_store %arg15[%c3_76, %c0_77, %c0_78], %113 {strides = array<i32>} : memref<4x8x8xbf16, #tpu.memory_space<vmem>>, vector<1x8x8xbf16>,
      %114 = vector.extract_strided_slice %83 {offsets = [0, 24], sizes = [8, 8], strides = [1, 1]} : vector<8x32xbf16> to vector<8x8xbf16>
      %c3_79 = arith.constant 3 : index
      %c0_80 = arith.constant 0 : index
      %c0_81 = arith.constant 0 : index
      %115 = vector.load %arg16[%c3_79, %c0_80, %c0_81] : memref<4x8x8xbf16, #tpu.memory_space<vmem>>, vector<1x8x8xbf16>
      %116 = vector.shape_cast %115 : vector<1x8x8xbf16> to vector<8x8xbf16>
      %117 = vector.shape_cast %114 : vector<8x8xbf16> to vector<1x8x8xbf16>
      tpu.vector_store %arg16[%c3_79, %c0_80, %c0_81], %117 {strides = array<i32>} : memref<4x8x8xbf16, #tpu.memory_space<vmem>>, vector<1x8x8xbf16>,
    } else {
    }
    %c0 = arith.constant 0 : index
    %c0_1 = arith.constant 0 : index
    %c0_2 = arith.constant 0 : index
    %3 = vector.load %arg3[%c0, %c0_1, %c0_2] : memref<1x8x32xbf16, #tpu.memory_space<vmem>>, vector<1x8x32xbf16>
    %4 = vector.shape_cast %3 : vector<1x8x32xbf16> to vector<8x32xbf16>
    %c0_3 = arith.constant 0 : index
    %c0_4 = arith.constant 0 : index
    %5 = vector.load %arg7[%c0_3, %c0_4] : memref<32x32xbf16, #tpu.memory_space<vmem>>, vector<32x32xbf16>
    %cst = arith.constant dense<0.000000e+00> : vector<8x32xf32>
    %6 = tpu.matmul %4, %5, %cst {dimension_numbers = #tpu.dot_dimension_numbers<[1], [0], [0], [1], [0, 0, 1, 1], [], []>} : vector<8x32xbf16>, vector<32x32xbf16>, vector<8x32xf32> -> vector<8x32xf32>
    %c0_5 = arith.constant 0 : index
    %c0_6 = arith.constant 0 : index
    %7 = vector.load %arg11[%c0_5, %c0_6] : memref<8x32xf32, #tpu.memory_space<vmem>>, vector<1x32xf32>
    %8 = vector.broadcast %7 : vector<1x32xf32> to vector<8x32xf32>
    %9 = arith.addf %6, %8 : vector<8x32xf32>
    %10 = arith.truncf %9 : vector<8x32xf32> to vector<8x32xbf16>
    %c1 = arith.constant 1 : index
    %c0_7 = arith.constant 0 : index
    %11 = vector.load %arg11[%c1, %c0_7] : memref<8x32xf32, #tpu.memory_space<vmem>>, vector<1x32xf32>
    %12 = vector.broadcast %11 : vector<1x32xf32> to vector<8x32xf32>
    %13 = arith.addf %6, %12 : vector<8x32xf32>
    %14 = arith.truncf %13 : vector<8x32xf32> to vector<8x32xbf16>
    %15 = vector.extract_strided_slice %10 {offsets = [0, 0], sizes = [8, 8], strides = [1, 1]} : vector<8x32xbf16> to vector<8x8xbf16>
    %c0_8 = arith.constant 0 : index
    %c0_9 = arith.constant 0 : index
    %c0_10 = arith.constant 0 : index
    %16 = vector.load %arg13[%c0_8, %c0_9, %c0_10] : memref<4x8x8xbf16, #tpu.memory_space<vmem>>, vector<1x8x8xbf16>
    %17 = vector.shape_cast %16 : vector<1x8x8xbf16> to vector<8x8xbf16>
    %18 = vector.shape_cast %15 : vector<8x8xbf16> to vector<1x8x8xbf16>
    tpu.vector_store %arg13[%c0_8, %c0_9, %c0_10], %18 {strides = array<i32>} : memref<4x8x8xbf16, #tpu.memory_space<vmem>>, vector<1x8x8xbf16>,
    %19 = vector.extract_strided_slice %14 {offsets = [0, 0], sizes = [8, 8], strides = [1, 1]} : vector<8x32xbf16> to vector<8x8xbf16>
    %c0_11 = arith.constant 0 : index
    %c0_12 = arith.constant 0 : index
    %c0_13 = arith.constant 0 : index
    %20 = vector.load %arg14[%c0_11, %c0_12, %c0_13] : memref<4x8x8xbf16, #tpu.memory_space<vmem>>, vector<1x8x8xbf16>
    %21 = vector.shape_cast %20 : vector<1x8x8xbf16> to vector<8x8xbf16>
    %22 = vector.shape_cast %19 : vector<8x8xbf16> to vector<1x8x8xbf16>
    tpu.vector_store %arg14[%c0_11, %c0_12, %c0_13], %22 {strides = array<i32>} : memref<4x8x8xbf16, #tpu.memory_space<vmem>>, vector<1x8x8xbf16>,
    %23 = vector.extract_strided_slice %10 {offsets = [0, 8], sizes = [8, 8], strides = [1, 1]} : vector<8x32xbf16> to vector<8x8xbf16>
    %c1_14 = arith.constant 1 : index
    %c0_15 = arith.constant 0 : index
    %c0_16 = arith.constant 0 : index
    %24 = vector.load %arg13[%c1_14, %c0_15, %c0_16] : memref<4x8x8xbf16, #tpu.memory_space<vmem>>, vector<1x8x8xbf16>
    %25 = vector.shape_cast %24 : vector<1x8x8xbf16> to vector<8x8xbf16>
    %26 = vector.shape_cast %23 : vector<8x8xbf16> to vector<1x8x8xbf16>
    tpu.vector_store %arg13[%c1_14, %c0_15, %c0_16], %26 {strides = array<i32>} : memref<4x8x8xbf16, #tpu.memory_space<vmem>>, vector<1x8x8xbf16>,
    %27 = vector.extract_strided_slice %14 {offsets = [0, 8], sizes = [8, 8], strides = [1, 1]} : vector<8x32xbf16> to vector<8x8xbf16>
    %c1_17 = arith.constant 1 : index
    %c0_18 = arith.constant 0 : index
    %c0_19 = arith.constant 0 : index
    %28 = vector.load %arg14[%c1_17, %c0_18, %c0_19] : memref<4x8x8xbf16, #tpu.memory_space<vmem>>, vector<1x8x8xbf16>
    %29 = vector.shape_cast %28 : vector<1x8x8xbf16> to vector<8x8xbf16>
    %30 = vector.shape_cast %27 : vector<8x8xbf16> to vector<1x8x8xbf16>
    tpu.vector_store %arg14[%c1_17, %c0_18, %c0_19], %30 {strides = array<i32>} : memref<4x8x8xbf16, #tpu.memory_space<vmem>>, vector<1x8x8xbf16>,
    %31 = vector.extract_strided_slice %10 {offsets = [0, 16], sizes = [8, 8], strides = [1, 1]} : vector<8x32xbf16> to vector<8x8xbf16>
    %c2 = arith.constant 2 : index
    %c0_20 = arith.constant 0 : index
    %c0_21 = arith.constant 0 : index
    %32 = vector.load %arg13[%c2, %c0_20, %c0_21] : memref<4x8x8xbf16, #tpu.memory_space<vmem>>, vector<1x8x8xbf16>
    %33 = vector.shape_cast %32 : vector<1x8x8xbf16> to vector<8x8xbf16>
    %34 = vector.shape_cast %31 : vector<8x8xbf16> to vector<1x8x8xbf16>
    tpu.vector_store %arg13[%c2, %c0_20, %c0_21], %34 {strides = array<i32>} : memref<4x8x8xbf16, #tpu.memory_space<vmem>>, vector<1x8x8xbf16>,
    %35 = vector.extract_strided_slice %14 {offsets = [0, 16], sizes = [8, 8], strides = [1, 1]} : vector<8x32xbf16> to vector<8x8xbf16>
    %c2_22 = arith.constant 2 : index
    %c0_23 = arith.constant 0 : index
    %c0_24 = arith.constant 0 : index
    %36 = vector.load %arg14[%c2_22, %c0_23, %c0_24] : memref<4x8x8xbf16, #tpu.memory_space<vmem>>, vector<1x8x8xbf16>
    %37 = vector.shape_cast %36 : vector<1x8x8xbf16> to vector<8x8xbf16>
    %38 = vector.shape_cast %35 : vector<8x8xbf16> to vector<1x8x8xbf16>
    tpu.vector_store %arg14[%c2_22, %c0_23, %c0_24], %38 {strides = array<i32>} : memref<4x8x8xbf16, #tpu.memory_space<vmem>>, vector<1x8x8xbf16>,
    %39 = vector.extract_strided_slice %10 {offsets = [0, 24], sizes = [8, 8], strides = [1, 1]} : vector<8x32xbf16> to vector<8x8xbf16>
    %c3 = arith.constant 3 : index
    %c0_25 = arith.constant 0 : index
    %c0_26 = arith.constant 0 : index
    %40 = vector.load %arg13[%c3, %c0_25, %c0_26] : memref<4x8x8xbf16, #tpu.memory_space<vmem>>, vector<1x8x8xbf16>
    %41 = vector.shape_cast %40 : vector<1x8x8xbf16> to vector<8x8xbf16>
    %42 = vector.shape_cast %39 : vector<8x8xbf16> to vector<1x8x8xbf16>
    tpu.vector_store %arg13[%c3, %c0_25, %c0_26], %42 {strides = array<i32>} : memref<4x8x8xbf16, #tpu.memory_space<vmem>>, vector<1x8x8xbf16>,
    %43 = vector.extract_strided_slice %14 {offsets = [0, 24], sizes = [8, 8], strides = [1, 1]} : vector<8x32xbf16> to vector<8x8xbf16>
    %c3_27 = arith.constant 3 : index
    %c0_28 = arith.constant 0 : index
    %c0_29 = arith.constant 0 : index
    %44 = vector.load %arg14[%c3_27, %c0_28, %c0_29] : memref<4x8x8xbf16, #tpu.memory_space<vmem>>, vector<1x8x8xbf16>
    %45 = vector.shape_cast %44 : vector<1x8x8xbf16> to vector<8x8xbf16>
    %46 = vector.shape_cast %43 : vector<8x8xbf16> to vector<1x8x8xbf16>
    tpu.vector_store %arg14[%c3_27, %c0_28, %c0_29], %46 {strides = array<i32>} : memref<4x8x8xbf16, #tpu.memory_space<vmem>>, vector<1x8x8xbf16>,
    %c8_i32 = arith.constant 8 : i32
    %47 = arith.muli %arg1, %c8_i32 : i32
    %48 = tpu.iota {dimensions = array<i32: 0>} : vector<8x8xi32>
    %49 = vector.broadcast %47 : i32 to vector<8x8xi32>
    %50 = arith.addi %48, %49 : vector<8x8xi32>
    %51 = tpu.iota {dimensions = array<i32: 1>} : vector<8x8xi32>
    %52 = arith.index_cast %arg0 : i32 to index
    %53 = memref.load %arg2[%52] : memref<2xi32, #tpu.memory_space<smem>>
    %54 = vector.broadcast %53 : i32 to vector<8x8xi32>
    %55 = arith.cmpi slt, %51, %54 : vector<8x8xi32>
    %56 = arith.subi %51, %50 : vector<8x8xi32>
    %c0_i32_30 = arith.constant 0 : i32
    %57 = vector.broadcast %c0_i32_30 : i32 to vector<8x8xi32>
    %58 = arith.cmpi sle, %56, %57 : vector<8x8xi32>
    %cst_31 = arith.constant 0.000000e+00 : f32
    %59 = vector.broadcast %cst_31 : f32 to vector<8x32xf32>
    %c0_32 = arith.constant 0 : index
    %c0_33 = arith.constant 0 : index
    %60 = vector.load %arg17[%c0_32, %c0_33] : memref<8x32xf32, #tpu.memory_space<vmem>>, vector<8x32xf32>
    tpu.vector_store %arg17[%c0_32, %c0_33], %59 {strides = array<i32>} : memref<8x32xf32, #tpu.memory_space<vmem>>, vector<8x32xf32>,
    %c0_i32_34 = arith.constant 0 : i32
    %c4_i32 = arith.constant 4 : i32
    %61 = arith.addi %c0_i32_34, %c4_i32 : i32
    %c1_i32 = arith.constant 1 : i32
    scf.for %arg18 = %c0_i32_34 to %61 step %c1_i32  : i32 {
      %69 = arith.index_cast %arg18 : i32 to index
      %c0_42 = arith.constant 0 : index
      %c0_43 = arith.constant 0 : index
      %70 = vector.load %arg13[%69, %c0_42, %c0_43] : memref<4x8x8xbf16, #tpu.memory_space<vmem>>, vector<1x8x8xbf16>
      %71 = vector.shape_cast %70 : vector<1x8x8xbf16> to vector<8x8xbf16>
      %72 = arith.index_cast %arg18 : i32 to index
      %c0_44 = arith.constant 0 : index
      %c0_45 = arith.constant 0 : index
      %73 = vector.load %arg15[%72, %c0_44, %c0_45] : memref<4x8x8xbf16, #tpu.memory_space<vmem>>, vector<1x8x8xbf16>
      %74 = vector.shape_cast %73 : vector<1x8x8xbf16> to vector<8x8xbf16>
      %cst_46 = arith.constant dense<0.000000e+00> : vector<8x8xf32>
      %75 = tpu.matmul %71, %74, %cst_46 {dimension_numbers = #tpu.dot_dimension_numbers<[1], [0], [0], [1], [0, 0, 1, 1], [], []>} : vector<8x8xbf16>, vector<8x8xbf16>, vector<8x8xf32> -> vector<8x8xf32>
      %76 = arith.index_cast %arg18 : i32 to index
      %c0_47 = arith.constant 0 : index
      %c0_48 = arith.constant 0 : index
      %77 = vector.load %arg14[%76, %c0_47, %c0_48] : memref<4x8x8xbf16, #tpu.memory_space<vmem>>, vector<1x8x8xbf16>
      %78 = vector.shape_cast %77 : vector<1x8x8xbf16> to vector<8x8xbf16>
      %79 = arith.index_cast %arg18 : i32 to index
      %c0_49 = arith.constant 0 : index
      %c0_50 = arith.constant 0 : index
      %80 = vector.load %arg6[%79, %c0_49, %c0_50] : memref<4x8x128xbf16, #tpu.memory_space<vmem>>, vector<1x8x128xbf16>
      %81 = vector.shape_cast %80 : vector<1x8x128xbf16> to vector<8x128xbf16>
      %cst_51 = arith.constant dense<0.000000e+00> : vector<8x128xf32>
      %82 = tpu.matmul %78, %81, %cst_51 {dimension_numbers = #tpu.dot_dimension_numbers<[1], [0], [0], [1], [0, 0, 1, 1], [], []>} : vector<8x8xbf16>, vector<8x128xbf16>, vector<8x128xf32> -> vector<8x128xf32>
      %c121_i32 = arith.constant 121 : i32
      %83 = tpu.dynamic_rotate %82 by %c121_i32 dim 1 {stride = 1 : si32, stride_dimension = 0 : si32} : vector<8x128xf32>, i32 -> vector<8x128xf32>
      %84 = vector.extract_strided_slice %83 {offsets = [0, 0], sizes = [8, 8], strides = [1, 1]} : vector<8x128xf32> to vector<8x8xf32>
      %cst_52 = arith.constant 0.000000e+00 : f32
      %85 = vector.broadcast %cst_52 : f32 to vector<8x8xf32>
      %86 = arith.select %58, %84, %85 : vector<8x8xi1>, vector<8x8xf32>
      %87 = arith.addf %75, %86 : vector<8x8xf32>
      %cst_53 = arith.constant -1.000000e+30 : f32
      %88 = vector.broadcast %cst_53 : f32 to vector<8x8xf32>
      %89 = arith.select %55, %87, %88 : vector<8x8xi1>, vector<8x8xf32>
      %cst_54 = arith.constant dense<0xFF800000> : vector<8xf32>
      %90 = vector.multi_reduction <maximumf>, %89, %cst_54 [1] : vector<8x8xf32> to vector<8xf32>
      %91 = vector.shape_cast %90 : vector<8xf32> to vector<8x1xf32>
      %92 = vector.broadcast %91 : vector<8x1xf32> to vector<8x8xf32>
      %93 = arith.subf %89, %92 : vector<8x8xf32>
      %94 = math.exp %93 : vector<8x8xf32>
      %cst_55 = arith.constant dense<0.000000e+00> : vector<8xf32>
      %95 = vector.multi_reduction <add>, %94, %cst_55 [1] : vector<8x8xf32> to vector<8xf32>
      %96 = vector.shape_cast %95 : vector<8xf32> to vector<8x1xf32>
      %97 = tpu.reciprocal %96 {approx = true} : vector<8x1xf32> -> vector<8x1xf32>
      %98 = vector.broadcast %97 : vector<8x1xf32> to vector<8x8xf32>
      %99 = arith.mulf %94, %98 : vector<8x8xf32>
      %100 = arith.truncf %99 : vector<8x8xf32> to vector<8x8xbf16>
      %101 = arith.index_cast %arg18 : i32 to index
      %c0_56 = arith.constant 0 : index
      %c0_57 = arith.constant 0 : index
      %102 = vector.load %arg16[%101, %c0_56, %c0_57] : memref<4x8x8xbf16, #tpu.memory_space<vmem>>, vector<1x8x8xbf16>
      %103 = vector.shape_cast %102 : vector<1x8x8xbf16> to vector<8x8xbf16>
      %cst_58 = arith.constant dense<0.000000e+00> : vector<8x8xf32>
      %104 = tpu.matmul %100, %103, %cst_58 {dimension_numbers = #tpu.dot_dimension_numbers<[1], [0], [0], [1], [0, 0, 1, 1], [], []>} : vector<8x8xbf16>, vector<8x8xbf16>, vector<8x8xf32> -> vector<8x8xf32>
      %c0_59 = arith.constant 0 : index
      %c0_60 = arith.constant 0 : index
      %105 = vector.load %arg17[%c0_59, %c0_60] : memref<8x32xf32, #tpu.memory_space<vmem>>, vector<8x32xf32>
      %106 = arith.truncf %104 : vector<8x8xf32> to vector<8x8xbf16>
      %107 = arith.index_cast %arg18 : i32 to index
      %c0_61 = arith.constant 0 : index
      %c0_62 = arith.constant 0 : index
      %108 = vector.load %arg10[%107, %c0_61, %c0_62] : memref<4x8x32xbf16, #tpu.memory_space<vmem>>, vector<1x8x32xbf16>
      %109 = vector.shape_cast %108 : vector<1x8x32xbf16> to vector<8x32xbf16>
      %cst_63 = arith.constant dense<0.000000e+00> : vector<8x32xf32>
      %110 = tpu.matmul %106, %109, %cst_63 {dimension_numbers = #tpu.dot_dimension_numbers<[1], [0], [0], [1], [0, 0, 1, 1], [], []>} : vector<8x8xbf16>, vector<8x32xbf16>, vector<8x32xf32> -> vector<8x32xf32>
      %111 = arith.addf %105, %110 : vector<8x32xf32>
      %c0_64 = arith.constant 0 : index
      %c0_65 = arith.constant 0 : index
      %112 = vector.load %arg17[%c0_64, %c0_65] : memref<8x32xf32, #tpu.memory_space<vmem>>, vector<8x32xf32>
      tpu.vector_store %arg17[%c0_64, %c0_65], %111 {strides = array<i32>} : memref<8x32xf32, #tpu.memory_space<vmem>>, vector<8x32xf32>,
    }
    %c4_i32_35 = arith.constant 4 : i32
    %c0_36 = arith.constant 0 : index
    %c0_37 = arith.constant 0 : index
    %62 = vector.load %arg17[%c0_36, %c0_37] : memref<8x32xf32, #tpu.memory_space<vmem>>, vector<8x32xf32>
    %c4 = arith.constant 4 : index
    %c0_38 = arith.constant 0 : index
    %63 = vector.load %arg11[%c4, %c0_38] : memref<8x32xf32, #tpu.memory_space<vmem>>, vector<1x32xf32>
    %64 = vector.broadcast %63 : vector<1x32xf32> to vector<8x32xf32>
    %65 = arith.addf %62, %64 : vector<8x32xf32>
    %c0_39 = arith.constant 0 : index
    %c0_40 = arith.constant 0 : index
    %c0_41 = arith.constant 0 : index
    %66 = vector.load %arg12[%c0_39, %c0_40, %c0_41] : memref<1x8x32xf32, #tpu.memory_space<vmem>>, vector<1x8x32xf32>
    %67 = vector.shape_cast %66 : vector<1x8x32xf32> to vector<8x32xf32>
    %68 = vector.shape_cast %65 : vector<8x32xf32> to vector<1x8x32xf32>
    tpu.vector_store %arg12[%c0_39, %c0_40, %c0_41], %68 {strides = array<i32>} : memref<1x8x32xf32, #tpu.memory_space<vmem>>, vector<1x8x32xf32>,
    return
  }
  func.func @transform_0(%arg0: i32, %arg1: i32, %arg2: memref<2xi32, #tpu.memory_space<smem>>) -> (i32, i32, i32) {
    %c0_i32 = arith.constant 0 : i32
    %c0_i32_0 = arith.constant 0 : i32
    return %arg0, %arg1, %c0_i32 : i32, i32, i32
  }
  func.func @transform_1(%arg0: i32, %arg1: i32, %arg2: memref<2xi32, #tpu.memory_space<smem>>) -> (i32, i32, i32) {
    %c0_i32 = arith.constant 0 : i32
    %c0_i32_0 = arith.constant 0 : i32
    %c0_i32_1 = arith.constant 0 : i32
    return %arg0, %c0_i32, %c0_i32_0 : i32, i32, i32
  }
  func.func @transform_2(%arg0: i32, %arg1: i32, %arg2: memref<2xi32, #tpu.memory_space<smem>>) -> (i32, i32, i32) {
    %c0_i32 = arith.constant 0 : i32
    %c0_i32_0 = arith.constant 0 : i32
    %c0_i32_1 = arith.constant 0 : i32
    return %arg0, %c0_i32, %c0_i32_0 : i32, i32, i32
  }
  func.func @transform_3(%arg0: i32, %arg1: i32, %arg2: memref<2xi32, #tpu.memory_space<smem>>) -> (i32, i32, i32) {
    %c0_i32 = arith.constant 0 : i32
    %c0_i32_0 = arith.constant 0 : i32
    %c0_i32_1 = arith.constant 0 : i32
    %c0_i32_2 = arith.constant 0 : i32
    return %c0_i32, %c0_i32_0, %c0_i32_1 : i32, i32, i32
  }
  func.func @transform_4(%arg0: i32, %arg1: i32, %arg2: memref<2xi32, #tpu.memory_space<smem>>) -> (i32, i32) {
    %c0_i32 = arith.constant 0 : i32
    %c0_i32_0 = arith.constant 0 : i32
    %c0_i32_1 = arith.constant 0 : i32
    return %c0_i32, %c0_i32_0 : i32, i32
  }
  func.func @transform_5(%arg0: i32, %arg1: i32, %arg2: memref<2xi32, #tpu.memory_space<smem>>) -> (i32, i32) {
    %c0_i32 = arith.constant 0 : i32
    %c0_i32_0 = arith.constant 0 : i32
    %c0_i32_1 = arith.constant 0 : i32
    return %c0_i32, %c0_i32_0 : i32, i32
  }
  func.func @transform_6(%arg0: i32, %arg1: i32, %arg2: memref<2xi32, #tpu.memory_space<smem>>) -> (i32, i32) {
    %c0_i32 = arith.constant 0 : i32
    %c0_i32_0 = arith.constant 0 : i32
    %c0_i32_1 = arith.constant 0 : i32
    return %c0_i32, %c0_i32_0 : i32, i32
  }
  func.func @transform_7(%arg0: i32, %arg1: i32, %arg2: memref<2xi32, #tpu.memory_space<smem>>) -> (i32, i32, i32) {
    %c0_i32 = arith.constant 0 : i32
    %c0_i32_0 = arith.constant 0 : i32
    %c0_i32_1 = arith.constant 0 : i32
    %c0_i32_2 = arith.constant 0 : i32
    return %c0_i32, %c0_i32_0, %c0_i32_1 : i32, i32, i32
  }
  func.func @transform_8(%arg0: i32, %arg1: i32, %arg2: memref<2xi32, #tpu.memory_space<smem>>) -> (i32, i32) {
    %c0_i32 = arith.constant 0 : i32
    %c0_i32_0 = arith.constant 0 : i32
    %c0_i32_1 = arith.constant 0 : i32
    return %c0_i32, %c0_i32_0 : i32, i32
  }
  func.func @transform_9(%arg0: i32, %arg1: i32, %arg2: memref<2xi32, #tpu.memory_space<smem>>) -> (i32, i32, i32) {
    %c0_i32 = arith.constant 0 : i32
    %c0_i32_0 = arith.constant 0 : i32
    return %arg0, %arg1, %c0_i32 : i32, i32, i32
  }
}

</mosaic_0001>

<bundles_post_ra>
// kernel: tpu_custom_call.1
= control target key start
LH: loop header
LB: loop body
LE: loop exit
PB: predicated region body
PF: predicated region fallthrough
CT: control target
= control target key end

     0   :  { %s1678_s16 = smov [#allocation8]   ;;  %s2076_s0 = inlined_call_operand.hbm [shape: s32[2], index: 0, kind: input, shape index: {}]   ;;  %s2077_s1 = inlined_call_operand.hbm [shape: bf16[2,8,32], index: 1, kind: input, shape index: {}]   ;;  %s2078_s2 = inlined_call_operand.hbm [shape: bf16[2,8,32], index: 2, kind: input, shape index: {}]   ;;  %s2079_s3 = inlined_call_operand.hbm [shape: bf16[2,8,32], index: 3, kind: input, shape index: {}]   ;;  %s2080_s4 = inlined_call_operand.hbm [shape: bf16[4,8,128], index: 4, kind: input, shape index: {}]   ;;  %s2081_s5 = inlined_call_operand.hbm [shape: bf16[32,32], index: 5, kind: input, shape index: {}]   ;;  %s2082_s6 = inlined_call_operand.hbm [shape: bf16[32,32], index: 6, kind: input, shape index: {}]   ;;  %s2083_s7 = inlined_call_operand.hbm [shape: bf16[32,32], index: 7, kind: input, shape index: {}]   ;;  %s2084_s8 = inlined_call_operand.hbm [shape: bf16[4,8,32], index: 8, kind: input, shape index: {}]   ;;  %s2085_s9 = inlined_call_operand.vmem [shape: f32[8,32], index: 9, kind: input, shape index: {}]   ;;  %s2086_s10 = inlined_call_operand.hbm [shape: f32[2,8,32], index: 10, kind: output, shape index: {}]  }
   0x1   :  { %2099 = sst [smem:[#allocation37_spill]] %s2078_s2  ;;  %s16_s15 = sshll.u32 %s2076_s0, 4  ;;  %s17_s15 = int_to_ptr.hbm [resolvable:$true] %s16_s15 }
   0x2   :  { %2100 = sst [smem:[#allocation38_spill]] %s2080_s4 }
   0x3   :  { %2101 = sst [smem:[#allocation39_spill]] %s2081_s5 }
   0x4   :  { %2102 = sst [smem:[#allocation40_spill]] %s2082_s6 }
   0x5   :  { %2103 = sst [smem:[#allocation41_spill]] %s2083_s7 }
   0x6   :  { %2104 = sst [smem:[#allocation42_spill]] %s2084_s8 }
   0x7   :  { %2105 = sst [smem:[#allocation43_spill]] %s2086_s10 }
   0x8   :  { %19 = dma.hbm_to_smem %s17_s15, 16, %s1678_s16, [#allocation7] }
   0x9   :  { %1624 = dma.done.wait [#allocation7], 16 }
   0xa   :  { %1625 = vsyncadd [#allocation7], 4294967280 }
   0xb   :  { %22 = sfence }
   0xc   :  { %23 = vsyncpa [#allocation10], 0 }
   0xd   :  { %25 = vsyncpa [#allocation10 + $0x1], 0 }
   0xe   :  { %26 = vsyncpa [#allocation13], 0 }
   0xf   :  { %28 = vsyncpa [#allocation13 + $0x1], 0 }
  0x10   :  { %29 = vsyncpa [#allocation16], 0 }
  0x11   :  { %30 = vsyncpa [#allocation19], 0 }
  0x12   :  { %31 = vsyncpa [#allocation22], 0 }
  0x13   :  { %32 = vsyncpa [#allocation11], 0 }
  0x14   :  { %34 = vsyncpa [#allocation11 + $0x1], 0  ;;  %s1749_s17 = smov 0   ;;  %s1751_s18 = smov 0  }
  0x15   :  { %s1753_s0 = smov 0   ;;  %s1755_s19 = smov 0  }
  0x16   :  { %s1757_s20 = smov 0   ;;  %s1759_s21 = smov 0  }
  0x17 LB: > { %2106 = sst [smem:[#allocation31_spill]] %s1652_s17  ;;  %s1780_s22 = sadd.s32 4294967295, %s1672_s21   ;;  %s1672_s21 = sphi %s1759_s21, %s40_s21   ;;  %s1668_s20 = sphi %s1757_s20, %s2138_s20   ;;  %s1664_s19 = sphi %s1755_s19, %s2137_s19   ;;  %s1660_s0 = sphi %s1753_s0, %s2141_s0   ;;  %s1656_s18 = sphi %s1751_s18, %s2140_s18   ;;  %s1652_s17 = sphi %s1749_s17, %s2139_s17  }
  0x18   : > { %2107 = sst [smem:[#allocation32_spill]] %s1668_s20  ;;  %p1098_p0 = scmp.ge.s32.totalorder %s1672_s21, 1 }
  0x19   : > { %2108 = sst [smem:[#allocation33_spill]] %s1672_s21  ;;  %p75_p1 = scmp.eq.s32.totalorder %s1780_s22, 0 }
  0x1a   : > { %p291_p2 = scmp.lt.s32.totalorder %s1672_s21, 3  ;;  %s2109_s4 = sld [smem:[#allocation38_spill]] }
  0x1b   : > { %s1679_s27 = smov [#allocation15]   ;;  %p1104_p6 = scmp.ge.s32.totalorder %s1672_s21, 2 }
  0x1c   : > { %p1788_p3 = pnand %p1098_p0, %p291_p2  ;;  %s304_s28 = sshll.u32 %s1679_s27, 4  ;;  %s305_s28 = int_to_ptr.vmem [resolvable:$true] %s304_s28 }
  0x1d   : > { %s2112_s6 = sld [smem:[#allocation40_spill]]  ;;  %s2087_s13 = smov 64  }
  0x1e   : > { %p1196_p4 = pneg %p1788_p3  ;;  %s2089_s14 = smov 4  }
  0x1f   : > { %s1682_s15 = smov [#allocation18]   ;;  %s1097_s23 = sadd.s32 4294967294, %s1672_s21  }
  0x20   : > { %s302_s25 = sshll.u32 %s2109_s4, 4  ;;  %p1796_p5 = pnand %p1196_p4, %p75_p1  ;;  %s303_s25 = int_to_ptr.hbm [resolvable:$true] %s302_s25 }
  0x21   : > { %s332_s16 = sshll.u32 %s1682_s15, 4  ;;  %s52_s24 = sadd.s32 1, %s1668_s20  ;;  %s333_s16 = int_to_ptr.vmem [resolvable:$true] %s332_s16 }
  0x22   : > { %1199 = dma.hbm_to_vmem [thread:$0]  (!%p1796_p5), %s303_s25, 256, %s305_s28, [#allocation16], %s2087_s13, %s2087_s13, %s2089_s14  }
  0x23   : > { %s330_s12 = sshll.u32 %s2112_s6, 4  ;;  %p54_p7 = scmp.ge.s32.totalorder %s52_s24, 2  ;;  %s331_s12 = int_to_ptr.hbm [resolvable:$true] %s330_s12 }
  0x24   : > { %1205 = dma.hbm_to_vmem [thread:$0]  (!%p1796_p5), %s331_s12, 256, %s333_s16, [#allocation19], %s2087_s13, %s2087_s13, %s2089_s14  }
  0x25   : > { %s61_s27 = sadd.s32 1, %s1660_s0  ;;  %p68_p8 = scmp.ne.s32.totalorder %s1660_s0, %s1656_s18 }
  0x26   : > { %p69_p9 = scmp.eq.s32.totalorder %s1672_s21, 0  ;;  %s2143_s24 = smov (%p54_p7, %s52_s24), 0 }
  0x27   : > { %2113 = sst [smem:[#allocation34_spill]] %s2143_s24  ;;  %p74_p11 = scmp.ne.s32.totalorder %s1656_s18, %s1652_s17 }
  0x28   : > { %p1822_p10 = por %p69_p9, %p68_p8  ;;  %s56_s28 = ssub.s32 %s1668_s20, %s2143_s24 }
  0x29   : > { %p278_p12 = scmp.eq.s32.totalorder %s1780_s22, 1  ;;  %p59_p13 = scmp.eq.s32.totalorder %s56_s28, 0 }
  0x2a   : > { %p1833_p0 = por %p75_p1, %p74_p11  ;;  %p284_p4 = scmp.eq.s32.totalorder %s1097_s23, 1 }
  0x2b   : > { %p1837_p2 = por %p278_p12, %p68_p8  ;;  %p1231_p9 = scmp.lt.s32.totalorder %s1672_s21, 2 }
  0x2c   : > { %s1842_s12 = scalar_select %p59_p13, %s1660_s0, %s61_s27  }
  0x2d   : > { %p1844_p7 = por %p284_p4, %p74_p11  ;;  %s2093_s16 = sand.u32 1, %s1660_s0  }
  0x2e   : > { %2117 = sst [smem:[#allocation35_spill]] %s1842_s12  ;;  %s1851_s13 = sshll.u32 %s1668_s20, 2 }
  0x2f   : > { %s2118_s15 = scalar_select %p1844_p7, 1, 0 }
  0x30   : > { %s1855_s28 = sshll.u32 %s2093_s16, 2  ;;  %p1859_p8 = pnand %p1231_p9, %p1822_p10 }
  0x31   : > { %2119 = sst [smem:[#allocation36_spill]] %s2118_s15  ;;  %s397_s23 = sand.u32 1, %s1672_s21  }
  0x32   : > { %s2121_s2 = sld [smem:[#allocation37_spill]]  ;;  %s401_s24 = scalar_lea.vmem [#allocation12], %s1855_s28 }
  0x33   : > { %s409_s20 = sshll.u32 %s401_s24, 4  ;;  %s2122_s5 = sld [smem:[#allocation39_spill]]  ;;  %s410_s20 = int_to_ptr.vmem [resolvable:$true] %s409_s20 }
  0x34   : > { %s1872_s17 = scalar_lea.sflag [#allocation13], %s397_s23  ;;  %s1683_s4 = smov [#allocation17]  }
  0x35   : > { %s318_s27 = sshll.u32 %s1683_s4, 4  ;;  %s2123_s7 = sld [smem:[#allocation41_spill]]  ;;  %s319_s27 = int_to_ptr.vmem [resolvable:$true] %s318_s27 }
  0x36   : > { %s2124_s15 = smov 4   ;;  %s2125_s16 = smov 64  }
  0x37   : > { %s2126_s8 = sld [smem:[#allocation42_spill]]  ;;  %s381_s23 = scalar_lea.vmem [#allocation9], %s1855_s28 }
  0x38   : > { %s405_s6 = scalar_lea.hbm %s2121_s2, %s1851_s13  ;;  %s1685_s2 = smov [#allocation21]  }
  0x39   : > { %s407_s12 = sshll.u32 %s405_s6, 4  ;;  %s316_s25 = sshll.u32 %s2122_s5, 4  ;;  %s408_s12 = int_to_ptr.hbm [resolvable:$true] %s407_s12  ;;  %s317_s25 = int_to_ptr.hbm [resolvable:$true] %s316_s25 }
  0x3a   : > { %1218 = dma.hbm_to_vmem [thread:$0]  (!%p1859_p8), %s408_s12, 64, %s410_s20, %s1872_s17  }
  0x3b   : > { %s344_s6 = sshll.u32 %s2123_s7, 4  ;;  %s1684_s12 = smov [#allocation20]   ;;  %s345_s6 = int_to_ptr.hbm [resolvable:$true] %s344_s6 }
  0x3c   : > { %1202 = dma.hbm_to_vmem [thread:$0]  (!%p1796_p5), %s317_s25, 256, %s319_s27, [#allocation16], %s2125_s16, %s2125_s16, %s2124_s15  }
  0x3d   : > { %s358_s20 = sshll.u32 %s2126_s8, 4  ;;  %s346_s4 = sshll.u32 %s1684_s12, 4  ;;  %s359_s20 = int_to_ptr.hbm [resolvable:$true] %s358_s20  ;;  %s347_s4 = int_to_ptr.vmem [resolvable:$true] %s346_s4 }
  0x3e   : > { %1208 = dma.hbm_to_vmem [thread:$0]  (!%p1796_p5), %s345_s6, 256, %s347_s4, [#allocation19], %s2125_s16, %s2125_s16, %s2124_s15  }
  0x3f   : > { %s360_s24 = sshll.u32 %s1685_s2, 4  ;;  %s386_s27 = scalar_lea.hbm %s2077_s1, %s1851_s13  ;;  %s361_s24 = int_to_ptr.vmem [resolvable:$true] %s360_s24 }
  0x40   : > { %1211 = dma.hbm_to_vmem [thread:$0]  (!%p1796_p5), %s359_s20, 256, %s361_s24, [#allocation22], %s2125_s16, %s2125_s16, %s2124_s15  }
  0x41   : > { %s390_s12 = sshll.u32 %s381_s23, 4  ;;  %s388_s7 = sshll.u32 %s386_s27, 4  ;;  %s391_s12 = int_to_ptr.vmem [resolvable:$true] %s390_s12  ;;  %s389_s7 = int_to_ptr.hbm [resolvable:$true] %s388_s7 }
  0x42   : > { %s2127_s6 = sand.u32 1, %s1660_s0   ;;  %s424_s8 = scalar_lea.hbm %s2079_s3, %s1851_s13 }
  0x43   : > { %s378_s4 = scalar_lea.sflag [#allocation10], %s2127_s6  ;;  %s420_s21 = scalar_lea.vmem [#allocation14], %s1855_s28 }
  0x44   : > { %1215 = dma.hbm_to_vmem [thread:$0]  (!%p1859_p8), %s389_s7, 64, %s391_s12, %s378_s4  }
  0x45   : > { %s428_s10 = sshll.u32 %s420_s21, 4  ;;  %s426_s15 = sshll.u32 %s424_s8, 4  ;;  %s429_s10 = int_to_ptr.vmem [resolvable:$true] %s428_s10  ;;  %s427_s15 = int_to_ptr.hbm [resolvable:$true] %s426_s15 }
  0x46   : > { %1221 = dma.hbm_to_vmem [thread:$0]  (!%p1859_p8), %s427_s15, 64, %s429_s10, %s1872_s17  }
  0x47   : > { %437 = sbr.rel (%p1788_p3) target bundleno = 1262 (0x4ee), region = 56  ;;  %s1918_s16 = sand.u32 (!%p1788_p3), 1, %s1656_s18  }
  0x48   : > { %s1921_s7 = sshll.u32 (!%p1788_p3), %s1918_s16, 2  ;;  %s440_s13 = scalar_lea.sflag (!%p1788_p3), [#allocation10], %s1918_s16 }
  0x49   : > { %s443_s28 = scalar_lea.vmem (!%p1788_p3), [#allocation9], %s1921_s7 }
  0x4c   : > { %1627 = dma.done.wait (%p1833_p0), %s440_s13, 64  }
  0x4d   : > { %1629 = vsyncadd (%p1833_p0), %s440_s13, 4294967232  ;;  %s449_s8 = sand.u32 1, %s1780_s22   ;;  %s453_s17 = scalar_lea.vmem [#allocation12], %s1921_s7 }
  0x4e   : > { %s450_s10 = scalar_lea.sflag [#allocation13], %s449_s8 }
  0x4f   : > { %1631 = dma.done.wait (%p1833_p0), %s450_s10, 128  }
  0x50   : > { %1633 = vsyncadd (%p1833_p0), %s450_s10, 4294967168  ;;  %s463_s21 = scalar_lea.vmem [#allocation14], %s1921_s7 }
  0x51   : > { %1635 = dma.done.wait (%p75_p1), [#allocation16], 512  }
  0x52   : > { %1637 = vsyncadd (%p75_p1), [#allocation16], 4294966784 }
  0x53   : > { %1639 = dma.done.wait (%p75_p1), [#allocation19], 512  }
  0x54   : > { %1641 = vsyncadd (%p75_p1), [#allocation19], 4294966784 }
  0x55   : > { %1643 = dma.done.wait (%p75_p1), [#allocation22], 256  }
  0x56   : > { %1645 = vsyncadd (%p75_p1), [#allocation22], 4294967040  ;;  %v750_v0 = vlaneseq  ;;  %s1120_s26 = sshll.u32 %s1918_s16, 3  ;;  %vm558_vm0 = vcmask 261120   ;;  %s756_s14 = sld [smem:[#allocation8 + %s1664_s19]]  ;;  %v1686_v1 = vmov 0.0  }
  0x57   : > { %761 = vst.msk [vmem:[#allocation6] sm:$0xff] %vm558_vm0, %v1686_v1  ;;  %v1163_v7 = vld [vmem:[#allocation18 + $0x8] sm:$0xff]  ;;  %v1167_v9 = vld [vmem:[#allocation17 + $0x8] sm:$0xff]  ;;  %v1162_v11 = vld [vmem:[#allocation18] sm:$0xff]  ;;  %vm647_vm3 = vcmask 60416   ;;  %s1687_s12 = smov 112  }
  0x58   : > { %v751_v2 = vshrl.u32 %v750_v0, 7  ;;  %v755_v3 = vand.u32 127, %v750_v0  ;;  %v1165_v10 = vld [vmem:[#allocation20 + $0x8] sm:$0xff]  ;;  %568 = vmatpush.bf16.msra.mxu0 %v1163_v7  ;;  %v1166_v12 = vld [vmem:[#allocation17] sm:$0xff]  ;;  %699 = vmatpush.bf16.msra.mxu2 %v1167_v9  ;;  %v672_v15 = vld [vmem:[%s443_s28] sm:$0xf] }
  0x59   : > { %v1164_v13 = vld [vmem:[#allocation20] sm:$0xff]  ;;  %603 = vmatpush.bf16.msra.mxu1 %v1165_v10  ;;  %v575_v16 = vld [vmem:[%s463_s21] sm:$0xf]  ;;  %s1688_s6 = smov 120   ;;  %s1689_s4 = smov 104  }
  0x5a   : > { %v759_v4 = vsub.s32 %v755_v3, %v751_v2  ;;  %v539_v14 = vld [vmem:[%s453_s17] sm:$0xf]  ;;  %v1307_v17 = vld [vmem:[%s2085_s9 + $0x2] ss:$0 sm:$0xff]  ;;  %v1308_v18 = vld [vmem:[%s2085_s9 + $0x3] ss:$0 sm:$0xff] }
  0x5b   : > { %v1309_v24 = vld [vmem:[%s2085_s9] ss:$0 sm:$0xff]  ;;  %v1310_v25 = vld [vmem:[%s2085_s9 + $0x1] ss:$0 sm:$0xff]  ;;  %s1998_s29 = scalar_lea.vmem [#allocation23], %s1120_s26  ;;  %s2000_s2 = smov 0  }
  0x5c   : > { %vm1951_vm1 = vcmp.le.s32.totalorder %v759_v4, 0  ;;  %v757_v6 = vstv %s756_s14  ;;  %569 = vmatpush.bf16.msra.mxu0 %v1162_v11  ;;  %700 = vmatpush.bf16.msra.mxu2 %v1166_v12 }
  0x5d   : > { %vm1955_vm2 = vcmp.lt.s32.totalorder %v755_v3, %v757_v6  ;;  %604 = vmatpush.bf16.msra.mxu1 %v1164_v13 }
  0x5f   : > { %1129 = vmatmul.msk.bf16.vlgmr.msra.gmra.mxu0 %vm558_vm0, %v539_v14  ;;  %1147 = vmatmul.msk.bf16.vlgmr.msra.gmra.mxu2 %vm558_vm0, %v672_v15 }
  0x60   : > { %1138 = vmatmul.msk.bf16.vlgmr.msra.gmra.mxu1 %vm558_vm0, %v575_v16 }
  0xdc   : > { %v571_v19 = vpop.f32.mrf.mxu0 }
  0xdd   : > { %v572_v20 = vadd.f32 %v1307_v17, %v571_v19  ;;  %v606_v21 = vpop.f32.mrf.mxu1 }
  0xde   : > { %v607_v22 = vadd.f32 %v1308_v18, %v606_v21 }
  0xdf   : > { %611 = vxpose.xlu0.b32.start.end [1/1] (short) (narrow) %v572_v20, 32 }
  0xe0   : > { %v610_v23 = vpack.c.bf16 %v607_v22, %v607_v22 }
  0xe2   : > { %649 = vst.msk [vmem:[#allocation5] sm:$0xf] %vm647_vm3, %v610_v23  ;;  %660 = vrot.lane.b32.xlu1 %v610_v23, %s1687_s12  ;;  %v702_v26 = vpop.f32.mrf.mxu2 }
  0xe3   : > { %v708_v28 = vadd.f32 %v1309_v24, %v702_v26  ;;  %v712_v29 = vadd.f32 %v1310_v25, %v702_v26 }
  0xe4   : > { %v573_v27 = vpop.f32.mrf.mxu0 }
  0xe5   : > { %v608_v30 = vpop.f32.mrf.mxu1  ;;  %v709_v31 = vpack.c.bf16 %v708_v28, %v708_v28  ;;  %v713_v32 = vpack.c.bf16 %v712_v29, %v712_v29 }
  0xe7   : > { %715 = vst.msk [vmem:[#allocation2] sm:$0xf] %vm647_vm3, %v709_v31  ;;  %718 = vrot.lane.b32.xlu2 %v709_v31, %s1688_s6 }
  0xe8   : > { %716 = vst.msk [vmem:[#allocation3] sm:$0xf] %vm647_vm3, %v713_v32 }
  0xea   : > { %667 = vrot.lane.b32.xlu1 %v610_v23, %s1689_s4  ;;  %v704_v33 = vpop.f32.mrf.mxu2 }
  0xef   : > { %724 = vrot.lane.b32.xlu2 %v713_v32, %s1688_s6 }
  0xf2   : > { %729 = vrot.lane.b32.xlu1 %v709_v31, %s1687_s12 }
  0xf7   : > { %734 = vrot.lane.b32.xlu2 %v713_v32, %s1687_s12 }
  0xfa   : > { %739 = vrot.lane.b32.xlu1 %v709_v31, %s1689_s4 }
  0xff   : > { %744 = vrot.lane.b32.xlu2 %v713_v32, %s1689_s4 }
 0x141   : > { %v719_v34 = vpop.permute.xlu2 %718 }
 0x142   : > { %722 = vst.msk [vmem:[#allocation2 + $0x4] sm:$0xf] %vm647_vm3, %v719_v34 }
 0x149   : > { %v725_v35 = vpop.permute.xlu2 %724 }
 0x14a   : > { %728 = vst.msk [vmem:[#allocation3 + $0x4] sm:$0xf] %vm647_vm3, %v725_v35 }
 0x151   : > { %v735_v37 = vpop.permute.xlu2 %734 }
 0x152   : > { %738 = vst.msk [vmem:[#allocation3 + $0x8] sm:$0xf] %vm647_vm3, %v735_v37 }
 0x154   : > { %v661_v36 = vpop.permute.xlu1 %660 }
 0x155   : > { %664 = vst.msk [vmem:[#allocation5 + $0x8] sm:$0xf] %vm647_vm3, %v661_v36 }
 0x159   : > { %v745_v38 = vpop.permute.xlu2 %744 }
 0x15a   : > { %748 = vst.msk [vmem:[#allocation3 + $0xc] sm:$0xf] %vm647_vm3, %v745_v38 }
 0x15c   : > { %v668_v39 = vpop.permute.xlu1 %667 }
 0x15d   : > { %671 = vst.msk [vmem:[#allocation5 + $0xc] sm:$0xf] %vm647_vm3, %v668_v39 }
 0x164   : > { %v730_v40 = vpop.permute.xlu1 %729 }
 0x165   : > { %653 = vrot.lane.b32.xlu0 %v610_v23, %s1688_s6  ;;  %733 = vst.msk [vmem:[#allocation2 + $0x8] sm:$0xf] %vm647_vm3, %v730_v40 }
 0x16c   : > { %v740_v41 = vpop.permute.xlu1 %739 }
 0x16d   : > { %743 = vst.msk [vmem:[#allocation2 + $0xc] sm:$0xf] %vm647_vm3, %v740_v41 }
 0x183   : > { %v627_v42 = vpop.trf.xlu0 }
 0x184   : > { %v643_v43 = vpack.c.bf16 %v627_v42, %v627_v42 }
 0x186   : > { %648 = vst.msk [vmem:[#allocation4] sm:$0xf] %vm647_vm3, %v643_v43 }
 0x18b   : > { %v628_v44 = vpop.trf.xlu0 }
 0x18c   : > { %v644_v45 = vpack.c.bf16 %v628_v44, %v628_v44 }
 0x18e   : > { %651 = vst.msk [vmem:[#allocation4 + $0x4] sm:$0xf] %vm647_vm3, %v644_v45 }
 0x193   : > { %v629_v46 = vpop.trf.xlu0 }
 0x194   : > { %v645_v47 = vpack.c.bf16 %v629_v46, %v629_v46 }
 0x196   : > { %659 = vst.msk [vmem:[#allocation4 + $0x8] sm:$0xf] %vm647_vm3, %v645_v47 }
 0x19b   : > { %v630_v48 = vpop.trf.xlu0 }
 0x19c   : > { %v646_v49 = vpack.c.bf16 %v630_v48, %v630_v48 }
 0x19e   : > { %666 = vst.msk [vmem:[#allocation4 + $0xc] sm:$0xf] %vm647_vm3, %v646_v49 }
 0x1d7   : > { %v654_v50 = vpop.permute.xlu0 %653 }
 0x1d8   : > { %657 = vst.msk [vmem:[#allocation5 + $0x4] sm:$0xf] %vm647_vm3, %v654_v50 }
 0x1d9 LB: >> { %s2006_s15 = sshll.u32 %s1676_s2, 2  ;;  %vm784_vm4 = vcmask 1043456   ;;  %vm780_vm5 = vcmask 64512   ;;  %s1690_s10 = smov 377   ;;  %v860_v20 = vld [vmem:[#allocation6] sm:$0xff]  ;;  %s1676_s2 = sphi %s2000_s2, %s767_s2  }
 0x1da   : >> { %s778_s7 = scalar_lea.vmem [#allocation15], %s2006_s15  ;;  %s772_s13 = scalar_lea.vmem [#allocation4], %s2006_s15 }
 0x1db   : >> { %v779_v51 = vld [vmem:[%s778_s7] sm:$0xf]  ;;  %s775_s28 = scalar_lea.vmem [#allocation3], %s2006_s15  ;;  %s769_s8 = scalar_lea.vmem [#allocation2], %s2006_s15 }
 0x1dc   : >> { %v786_v52 = vsel %vm784_vm4, %v779_v51, 0  ;;  %v773_v53 = vld [vmem:[%s772_s13] sm:$0xf]  ;;  %s839_s17 = scalar_lea.vmem [#allocation5], %s2006_s15  ;;  %s863_s21 = scalar_lea.vmem [#allocation21], %s2006_s15 }
 0x1dd   : >> { %795 = vmatpush.bf16.msra.mxu0 %v786_v52  ;;  %v776_v54 = vld [vmem:[%s775_s28] sm:$0xf]  ;;  %v810_v55 = vsel %vm784_vm4, %v773_v53, 0  ;;  %s767_s2 = sadd.s32 1, %s1676_s2  }
 0x1de   : >> { %819 = vmatpush.bf16.msra.mxu1 %v810_v55  ;;  %v770_v56 = vld [vmem:[%s769_s8] sm:$0xf]  ;;  %p764_p1 = scmp.ge.s32.totalorder %s767_s2, 4  }
 0x1df   : >> { %v840_v9 = vld [vmem:[%s839_s17] sm:$0xf]  ;;  %v1315_v25 = vld [vmem:[%s2085_s9 + $0x4] ss:$0 sm:$0xff] (%p764_p1)  ;;  %s1159_s22 = sshll.u32 (%p764_p1), %s1664_s19, 3  ;;  %s905_s30 = sshll.u32 (%p764_p1), %s1998_s29, 4  ;;  %s906_s30 = int_to_ptr.vmem [resolvable:$true] %s905_s30 }
 0x1e0   : >> { %1152 = vmatmul.msk.bf16.vlgmr.msra.gmra.mxu0 %vm780_vm5, %v776_v54  ;;  %v845_v10 = vsel %vm784_vm4, %v840_v9, 0  ;;  %v864_v15 = vld [vmem:[%s863_s21] sm:$0xf]  ;;  %s2132_s5 = sld [smem:[#allocation43_spill]] (%p764_p1)  ;;  %s892_s23 = scalar_lea.sflag (%p764_p1), [#allocation11], %s1918_s16 }
 0x1e1   : >> { %1153 = vmatmul.msk.bf16.vlgmr.msra.gmra.mxu1 %vm780_vm5, %v770_v56  ;;  %854 = vmatpush.bf16.msra.mxu2 %v845_v10  ;;  %v869_v16 = vsel %vm784_vm4, %v864_v15, 0 }
 0x1e2   : >> { %878 = vmatpush.bf16.msra.mxu3 %v869_v16 }
 0x1e6   : > { %s903_s25 = scalar_lea.hbm (%p764_p1), %s2132_s5, %s1159_s22  ;;  %s1588_s2 = scalar_lea.hbm (%p764_p1), %s2132_s5, 16 }
 0x1e7   : > { %s907_s27 = sshll.u32 (%p764_p1), %s903_s25, 4  ;;  %s908_s27 = int_to_ptr.hbm [resolvable:$true] %s907_s27 }
 0x1e8   : > { %s1582_s12 = sshra.s32 (%p764_p1), %s908_s27, 4  ;;  %s1583_s12 = int_to_ptr.hbm [resolvable:$true] %s1582_s12 }
 0x1e9   : > { %s1584_s6 = scalar_lea.hbm (%p764_p1), %s1583_s12, 8  ;;  %p1589_p11 = scmp.lt.s32.totalorder (%p764_p1), %s1583_s12, %s2132_s5 }
 0x1ea   : > { %p1585_p3 = scmp.ne.s32.totalorder (%p764_p1), %s1583_s12, %s1584_s6  ;;  %p1590_p12 = scmp.lt.s32.totalorder (%p764_p1), %s1588_s2, %s1584_s6 }
 0x1ec   : > { %p1586_p5 = pnand (%p764_p1), %p1585_p3, %p1837_p2  ;;  %p1591_p13 = por (%p764_p1), %p1590_p12, %p1589_p11 }
 0x1ee   : > { %p1587_p10 = pneg (%p764_p1), %p1586_p5 }
 0x1f0   : > { %p1592_p0 = pnand (%p764_p1), %p1591_p13, %p1587_p10 }
 0x25d   : >> { %v797_v57 = vpop.f32.mrf.mxu0 }
 0x25e   : >> { %803 = vrot.lane.b32.xlu0 %v797_v57, %s1690_s10  ;;  %v821_v58 = vpop.f32.mrf.mxu1 }
 0x265   : >> { %v799_v59 = vpop.f32.mrf.mxu0 }
 0x266   : >> { %v823_v60 = vpop.f32.mrf.mxu1 }
 0x2d0   : >> { %v804_v61 = vpop.permute.xlu0 %803 }
 0x2d1   : >> { %v805_v62 = vsel %vm1951_vm1, %v804_v61, 0.0 }
 0x2d2   : >> { %v822_v63 = vadd.f32 %v821_v58, %v805_v62 }
 0x2d4   : >> { %v825_v0 = vsel %vm1955_vm2, %v822_v63, -1e+30 }
 0x2d5   : >> { %v826_v1 = vsel %vm780_vm5, %v825_v0, -inf }
 0x2d6   : >> { %827 = vmax.xlane.f32.xlu0 %v826_v1 }
 0x349   : >> { %v828_v2 = vpop.xlane.xlu0 %827 }
 0x34a   : >> { %v829_v3 = vsub.f32 %v825_v0, %v828_v2 }
 0x34c   : >> { %v830_v4 = vmul.f32 1.442695, %v829_v3 }
 0x34e   : >> { %1311 = vpow2.f32 %v830_v4 }
 0x354   : >> { %v1312_v6 = vpop.eup %1311 }
 0x355   : >> { %v832_v7 = vsel %vm780_vm5, %v1312_v6, 0.0 }
 0x356   : >> { %833 = vadd.xlane.f32.xlu1 %v832_v7 }
 0x3c9   : >> { %v834_v11 = vpop.xlane.xlu1 %833 }
 0x3ca   : >> { %1313 = vrcp.f32 %v834_v11 }
 0x3d0   : >> { %v1314_v12 = vpop.eup %1313 }
 0x3d1   : >> { %v836_v13 = vmul.f32 %v1314_v12, %v1312_v6 }
 0x3d3   : >> { %v837_v14 = vpack.c.bf16 %v836_v13, %v836_v13 }
 0x3d5   : >> { %1155 = vmatmul.msk.bf16.vlgmr.msra.gmra.mxu2 %vm780_vm5, %v837_v14 }
 0x458   : >> { %v856_v17 = vpop.f32.mrf.mxu2 }
 0x459   : >> { %v861_v18 = vpack.c.bf16 %v856_v17, %v856_v17 }
 0x45b   : >> { %1157 = vmatmul.msk.bf16.vlgmr.msra.gmra.mxu3 %vm780_vm5, %v861_v18 }
 0x460   : >> { %v858_v19 = vpop.f32.mrf.mxu2 }
 0x4de   : >> { %v880_v21 = vpop.f32.mrf.mxu3 }
 0x4df   : >> { %v884_v22 = vadd.f32 %v880_v21, %v860_v20 }
 0x4e1   : >> { %885 = vst.msk [vmem:[#allocation6] sm:$0xff] %vm558_vm0, %v884_v22 }
 0x4e6   : >> { %v882_v23 = vpop.f32.mrf.mxu3  ;;  %766 = sbr.rel (!%p764_p1) target bundleno = 473 (0x1d9), region = 174 }
 0x4e8   : > { %v886_v24 = vld [vmem:[#allocation6] sm:$0xff] (%p764_p1) }
 0x4e9   : > { %v889_v26 = vadd.f32 (%p764_p1), %v1315_v25, %v886_v24 }
 0x4eb   : > { %890 = vst.msk [vmem:[%s1998_s29] sm:$0xff] %vm558_vm0, %v889_v26 }
 0x4ec   : > { %1595 = shalt.err (!%p1592_p0)
}
 0x4ed   : > { %1194 = dma.vmem_to_hbm [thread:$0]  (%p1837_p2), %s906_s30, 128, %s908_s27, %s892_s23  }
 0x4ee PF: > { %s2133_s16 = sld [smem:[#allocation31_spill]]  ;;  %p1223_p4 = pnand %p1104_p6, %p1844_p7 }
 0x4ef   : > { %s2135_s13 = sld [smem:[#allocation33_spill]] }
 0x4f0   : > { %p1224_p9 = pneg %p1223_p4 }
 0x4f4   : > { %s919_s28 = sand.u32 1, %s2133_s16  }
 0x4f5   : > { %s920_s8 = scalar_lea.sflag [#allocation11], %s919_s28 }
 0x4f6   : > { %1647 = dma.done.wait (%p1224_p9), %s920_s8, 128  }
 0x4f7   : > { %1649 = vsyncadd (%p1224_p9), %s920_s8, 4294967168  ;;  %s40_s21 = sadd.s32 1, %s2135_s13   ;;  %s2136_s10 = sld [smem:[#allocation35_spill]] }
 0x4f8   : > { %p37_p8 = scmp.ge.s32.totalorder %s40_s21, 4   ;;  %s2137_s19 = sld [smem:[#allocation32_spill]] }
 0x4f9   : > { %s2138_s20 = sld [smem:[#allocation34_spill]]  ;;  %s2139_s17 = smov %s1656_s18 }
 0x4fa   : > { %s2140_s18 = smov %s1660_s0  ;;  %39 = sbr.rel (!%p37_p8) target bundleno = 23 (0x17), region = 185 }
 0x4fd   : > { %s2141_s0 = smov %s2136_s10 }
 0x4ff   :  { %926 = vsyncpa [#allocation10], 1 }
 0x500   :  { %928 = vsyncpa [#allocation10 + $0x1], 1 }
 0x501   :  { %929 = vsyncpa [#allocation13], 1 }
 0x502   :  { %931 = vsyncpa [#allocation13 + $0x1], 1 }
 0x503   :  { %932 = vsyncpa [#allocation16], 1 }
 0x504   :  { %933 = vsyncpa [#allocation19], 1 }
 0x505   :  { %934 = vsyncpa [#allocation22], 1 }
 0x506   :  { %935 = vsyncpa [#allocation11], 1 }
 0x507   :  { %937 = vsyncpa [#allocation11 + $0x1], 1 }

</bundles_post_ra>
